<compile_context>
chip_gen: v6e
topology: v6e:2x2x1
jax: 0.10.0
libtpu: 0.0.40
codegen_flags: <defaults>
</compile_context>

<pallas_src>
import functools

import jax
import jax.numpy as jnp
from jax.experimental import pallas as pl
from jax.experimental.pallas import tpu as pltpu


_VEC_ORDER = ("bs1", "bs2", "bc1", "bc2", "a_b", "bn_scale", "bn_shift", "gate")


def _round8(n):
    return ((n + 7) // 8) * 8


def _vec_layout(rpi, cpi, cp):
    """Static row offsets/lengths of each packed vector inside the (V, 1) slab."""
    lens = dict(bs1=rpi, bs2=cpi, bc1=rpi, bc2=cpi,
                a_b=cp, bn_scale=cp, bn_shift=cp, gate=cp)
    off, cur = {}, 0
    for name in _VEC_ORDER:
        off[name] = (cur, lens[name])
        cur += _round8(lens[name])          # keep every segment sublane-aligned
    return off, cur


def _block_diag(a, b):
    ra, ca = a.shape
    rb, cb = b.shape
    top = jnp.concatenate([a, jnp.zeros((ra, cb), a.dtype)], axis=1)
    bot = jnp.concatenate([jnp.zeros((rb, ca), b.dtype), b], axis=1)
    return jnp.concatenate([top, bot], axis=0)


def _pick_tile(n_pad):
    # largest lane tile (<=1024) dividing the padded point count
    for t in (1024, 512, 256, 128):
        if n_pad % t == 0:
            return t
    return n_pad


# ----------------------------------------------------------------------------
# Pallas kernel.
# grid = (B, 2, n_tiles):  phase 0 = accumulate per-batch channel-att max,
#                          phase 1 = apply channel gate + align_mlp + sigmoid gate.
# ----------------------------------------------------------------------------
def _gate_kernel(pts_ref, img_ref, ws1_ref, ws2_ref, wc1_ref, wc2_ref, aw_ref,
                 vec_ref, out_ref, cmax_ref, *, cp, tile, n_valid, need_mask, off):
    f32 = jnp.float32
    bf16 = jnp.bfloat16
    phase = pl.program_id(1)
    nt = pl.program_id(2)

    vec = vec_ref[...]                        # (V, 1) f32 packed vectors

    def seg(name):                            # static sublane slice of the slab
        o, ln = off[name]
        return vec[o:o + ln]

    # reset the per-batch channel-max accumulator at the start of pass 0
    @pl.when((phase == 0) & (nt == 0))
    def _():
        cmax_ref[...] = jnp.full(cmax_ref.shape, -jnp.inf, dtype=cmax_ref.dtype)

    # ---- shared work (both phases): spatial attention of both PBMAs ---------
    xp = pts_ref[0]                           # (cp, tile) bf16
    xi = img_ref[0]                           # (ci, tile) bf16
    x = jnp.concatenate([xp, xi], axis=0)     # (cp+ci, tile) bf16 (MXU input)

    h = jnp.maximum(
        jnp.dot(ws1_ref[...], x, preferred_element_type=f32) + seg("bs1"), 0.0)
    s = jnp.dot(ws2_ref[...], h.astype(bf16), preferred_element_type=f32) + seg("bs2")
    satt_p = jax.nn.sigmoid(jnp.max(s[:cp], axis=0, keepdims=True))   # (1, tile) f32
    satt_i = jax.nn.sigmoid(jnp.max(s[cp:], axis=0, keepdims=True))
    # per-tile f32 elementwise (v5e-safe); footprint is bounded by the tile.
    x2 = jnp.concatenate([satt_p * xp.astype(f32),
                          satt_i * xi.astype(f32)], axis=0)           # (cp+ci, tile)

    # ---- phase 0: accumulate per-batch channel-attention max ----------------
    @pl.when(phase == 0)
    def _():
        x2b = x2.astype(bf16)
        h2 = jnp.maximum(
            jnp.dot(wc1_ref[...], x2b, preferred_element_type=f32) + seg("bc1"), 0.0)
        c = jnp.dot(wc2_ref[...], h2.astype(bf16),
                    preferred_element_type=f32) + seg("bc2")          # (cp+ci, tile)
        if need_mask:  # static: only when N was lane-padded
            col = nt * tile + jax.lax.broadcasted_iota(jnp.int32, (1, tile), 1)
            c = jnp.where(col < n_valid, c, -jnp.inf)
        cmax_ref[...] = jnp.maximum(cmax_ref[...],
                                    jnp.max(c, axis=1, keepdims=True))

    # ---- phase 1: channel gate + align_mlp + learnable gate -> output -------
    @pl.when(phase == 1)
    def _():
        catt = jax.nn.sigmoid(cmax_ref[...])      # (cp+ci, 1) f32
        x3_p = catt[:cp] * x2[:cp]                # (cp, tile)
        x3_i = catt[cp:] * x2[cp:]                # (ci, tile)

        aligned = jnp.dot(aw_ref[...], x3_i.astype(bf16),
                          preferred_element_type=f32) + seg("a_b")
        aligned = jnp.maximum(aligned * seg("bn_scale") + seg("bn_shift"), 0.0)

        w = jax.nn.sigmoid(seg("gate"))           # (cp, 1)
        out_ref[0] = (w * x3_p + (1.0 - w) * aligned).astype(out_ref.dtype)


# ----------------------------------------------------------------------------
# grid_sample glue (bilinear, align_corners=False, padding_mode='zeros')
# flat single-axis gather over H*W (XLA side; no clean Pallas gather here).
# ----------------------------------------------------------------------------
def grid_sample_bilinear(img, grid):
    """img: (B, C, H, W); grid: (B, N, 2) with (x, y) in [-1, 1]. -> (B, C, N)."""
    B, C, H, W = img.shape
    gx = grid[..., 0]
    gy = grid[..., 1]
    ix = ((gx + 1.0) * W - 1.0) / 2.0
    iy = ((gy + 1.0) * H - 1.0) / 2.0
    x0 = jnp.floor(ix)
    y0 = jnp.floor(iy)
    x1 = x0 + 1.0
    y1 = y0 + 1.0
    wx1 = ix - x0
    wx0 = 1.0 - wx1
    wy1 = iy - y0
    wy0 = 1.0 - wy1
    img_flat = img.reshape(B, C, H * W)

    def gather(xi, yi):
        valid = (xi >= 0) & (xi <= W - 1) & (yi >= 0) & (yi <= H - 1)
        xc = jnp.clip(xi, 0, W - 1).astype(jnp.int32)
        yc = jnp.clip(yi, 0, H - 1).astype(jnp.int32)
        flat = (yc * W + xc)[:, None, :]                      # (B, 1, N)
        vals = jnp.take_along_axis(img_flat, flat, axis=2)    # (B, C, N)
        return vals * valid[:, None, :].astype(img.dtype)

    return (gather(x0, y0) * (wx0 * wy0)[:, None, :]
            + gather(x1, y0) * (wx1 * wy0)[:, None, :]
            + gather(x0, y1) * (wx0 * wy1)[:, None, :]
            + gather(x1, y1) * (wx1 * wy1)[:, None, :])


# ----------------------------------------------------------------------------
# Wrapper
# ----------------------------------------------------------------------------
@jax.jit
def pointwise_gate6(pts_img, img_feats, pts_feats, packed):
    """pts_img: (B, N, 2); img_feats: (B, C_I, H, W); pts_feats: (B, C_P, N).
    Returns (B, C_P, N) float32."""
    B, C_P, N = pts_feats.shape
    C_I = img_feats.shape[1]

    n_pad = ((N + 127) // 128) * 128
    tile = _pick_tile(n_pad)
    n_tiles = n_pad // tile

    sampled = grid_sample_bilinear(img_feats, pts_img)        # (B, C_I, N)

    pts = pts_feats
    img = sampled
    if n_pad != N:
        pts = jnp.pad(pts, ((0, 0), (0, 0), (0, n_pad - N)))
        img = jnp.pad(img, ((0, 0), (0, 0), (0, n_pad - N)))
    # bf16 HBM->VMEM stream of the big operands; fed straight to the MXU.
    pts = pts.astype(jnp.bfloat16)
    img = img.astype(jnp.bfloat16)

    off, _ = _vec_layout(packed["ws1"].shape[0], C_P + C_I, C_P)
    kernel = functools.partial(
        _gate_kernel, cp=C_P, tile=tile, n_valid=N,
        need_mask=(n_pad != N), off=off)

    full = lambda a: pl.BlockSpec(a.shape, lambda b, ph, nt: (0, 0))

    out = pl.pallas_call(
        kernel,
        out_shape=jax.ShapeDtypeStruct((B, C_P, n_pad), jnp.float32),
        grid_spec=pltpu.PrefetchScalarGridSpec(
            num_scalar_prefetch=0,
            grid=(B, 2, n_tiles),
            in_specs=[
                pl.BlockSpec((1, C_P, tile), lambda b, ph, nt: (b, 0, nt)),
                pl.BlockSpec((1, C_I, tile), lambda b, ph, nt: (b, 0, nt)),
                full(packed["ws1"]), full(packed["ws2"]),
                full(packed["wc1"]), full(packed["wc2"]),
                full(packed["a_w"]), full(packed["vec"]),
            ],
            # phase 0 parks the output on block (b,0,0) (never flushed with
            # garbage since it is fully rewritten at phase 1 / nt 0);
            # phase 1 writes real (b, :, nt) blocks.
            out_specs=pl.BlockSpec((1, C_P, tile),
                                   lambda b, ph, nt: (b, 0, nt * ph)),
            scratch_shapes=[pltpu.VMEM((C_P + C_I, 1), jnp.float32)],
        ),
        compiler_params=pltpu.CompilerParams(
            dimension_semantics=("parallel", "arbitrary", "arbitrary")),
    )(pts, img, packed["ws1"], packed["ws2"], packed["wc1"], packed["wc2"],
      packed["a_w"], packed["vec"])

    if n_pad != N:
        out = out[:, :, :N]
    return out                                                # (B, C_P, N)


# ----------------------------------------------------------------------------
# Parameter packing (done once, outside jit): block-diagonal merge of the two
# PBMA blocks (+ bf16 cast for the MXU) and a single packed (V, 1) f32 slab.
# ----------------------------------------------------------------------------
def pack_params(params):
    p = {k: jnp.asarray(v, jnp.float32) for k, v in params.items()}
    rp, cp = p["p_ws1"].shape
    ri, ci = p["i_ws1"].shape

    packed = dict(
        ws1=_block_diag(p["p_ws1"], p["i_ws1"]).astype(jnp.bfloat16),
        ws2=_block_diag(p["p_ws2"], p["i_ws2"]).astype(jnp.bfloat16),
        wc1=_block_diag(p["p_wc1"], p["i_wc1"]).astype(jnp.bfloat16),
        wc2=_block_diag(p["p_wc2"], p["i_wc2"]).astype(jnp.bfloat16),
        a_w=p["a_w"].astype(jnp.bfloat16),
    )
    vec_map = dict(
        bs1=jnp.concatenate([p["p_bs1"], p["i_bs1"]], axis=0),
        bs2=jnp.concatenate([p["p_bs2"], p["i_bs2"]], axis=0),
        bc1=jnp.concatenate([p["p_bc1"], p["i_bc1"]], axis=0),
        bc2=jnp.concatenate([p["p_bc2"], p["i_bc2"]], axis=0),
        a_b=p["a_b"], bn_scale=p["bn_scale"], bn_shift=p["bn_shift"],
        gate=p["gate"],
    )
    off, _ = _vec_layout(rp + ri, cp + ci, cp)
    pieces = []
    for name in _VEC_ORDER:
        _, ln = off[name]
        v = vec_map[name].reshape(ln, 1)
        padrows = _round8(ln) - ln
        if padrows:
            v = jnp.pad(v, ((0, padrows), (0, 0)))
        pieces.append(v)
    packed["vec"] = jnp.concatenate(pieces, axis=0)   # (V, 1) float32
    return packed


# ----------------------------------------------------------------------------
# Deterministic parameter construction (synthetic; mirrors module __init__)
# ----------------------------------------------------------------------------
def make_params(key, img_channels, pts_channels, reduction):
    keys = iter(jax.random.split(key, 64))

    def w(shape, scale=0.1):
        return (scale * jax.random.normal(next(keys), shape)).astype(jnp.float32)

    def b(c):
        return w((c, 1), 0.05)

    cp, ci = pts_channels, img_channels
    cpr, cir = cp // reduction, ci // reduction

    bn_gamma = 1.0 + 0.1 * jax.random.normal(next(keys), (cp, 1))
    bn_beta = 0.05 * jax.random.normal(next(keys), (cp, 1))
    bn_mean = 0.05 * jax.random.normal(next(keys), (cp, 1))
    bn_var = 0.5 + jnp.abs(jax.random.normal(next(keys), (cp, 1)))
    eps = 1e-5
    bn_scale = (bn_gamma / jnp.sqrt(bn_var + eps)).astype(jnp.float32)
    bn_shift = (bn_beta - bn_mean * bn_scale).astype(jnp.float32)

    return dict(
        # pts PBMA: spatial branch then channel branch
        p_ws1=w((cpr, cp)), p_bs1=b(cpr), p_ws2=w((cp, cpr)), p_bs2=b(cp),
        p_wc1=w((cpr, cp)), p_bc1=b(cpr), p_wc2=w((cp, cpr)), p_bc2=b(cp),
        # img PBMA
        i_ws1=w((cir, ci)), i_bs1=b(cir), i_ws2=w((ci, cir)), i_bs2=b(ci),
        i_wc1=w((cir, ci)), i_bc1=b(cir), i_wc2=w((ci, cir)), i_bc2=b(ci),
        # align_mlp conv + folded eval-mode BN
        a_w=w((cp, ci)), a_b=b(cp), bn_scale=bn_scale, bn_shift=bn_shift,
        # gate initialized to zeros (as in the module) -> sigmoid = 0.5
        gate=jnp.zeros((cp, 1), jnp.float32),
    )


if __name__ == "__main__":
    B, C_I, C_P, N, H, W, RED = 2, 16, 32, 128, 16, 16, 4

    key = jax.random.PRNGKey(0)
    k_pts_img, k_img, k_pts, k_par = jax.random.split(key, 4)

    pts_img = jax.random.uniform(k_pts_img, (B, N, 2),
                                 minval=-1.0, maxval=1.0).astype(jnp.float32)
    img_feats = jax.random.normal(k_img, (B, C_I, H, W)).astype(jnp.float32)
    pts_feats = jax.random.normal(k_pts, (B, C_P, N)).astype(jnp.float32)

    params = make_params(k_par, C_I, C_P, RED)
    packed = pack_params(params)

    out = pointwise_gate6(pts_img, img_feats, pts_feats, packed)
    jax.block_until_ready(out)
    assert out.shape == (B, C_P, N)
    print("KERNEL_OK")
</pallas_src>

<mosaic_0001>
module attributes {stable_mosaic.version = 11 : i64} {
  func.func @_gate_kernel(%arg0: i32, %arg1: i32, %arg2: i32, %arg3: memref<1x32x128xbf16, #tpu.memory_space<vmem>>, %arg4: memref<1x16x128xbf16, #tpu.memory_space<vmem>>, %arg5: memref<12x48xbf16, #tpu.memory_space<vmem>>, %arg6: memref<48x12xbf16, #tpu.memory_space<vmem>>, %arg7: memref<12x48xbf16, #tpu.memory_space<vmem>>, %arg8: memref<48x12xbf16, #tpu.memory_space<vmem>>, %arg9: memref<32x16xbf16, #tpu.memory_space<vmem>>, %arg10: memref<256x1xf32, #tpu.memory_space<vmem>>, %arg11: memref<1x32x128xf32, #tpu.memory_space<vmem>>, %arg12: memref<48x1xf32, #tpu.memory_space<vmem>>) attributes {dimension_semantics = [#tpu.dimension_semantics<parallel>, #tpu.dimension_semantics<arbitrary>, #tpu.dimension_semantics<arbitrary>], iteration_bounds = array<i64: 2, 2, 1>, scalar_prefetch = 0 : i64, scratch_operands = 1 : i64, tpu.core_type = #tpu.core_type<tc>, window_params = [{transform_indices = @transform_0, window_bounds = array<i64: 1, 32, 128>}, {transform_indices = @transform_1, window_bounds = array<i64: 1, 16, 128>}, {pipeline_mode = #tpu.pipeline_mode<synchronous>, transform_indices = @transform_2, window_bounds = array<i64: 12, 48>}, {pipeline_mode = #tpu.pipeline_mode<synchronous>, transform_indices = @transform_3, window_bounds = array<i64: 48, 12>}, {pipeline_mode = #tpu.pipeline_mode<synchronous>, transform_indices = @transform_4, window_bounds = array<i64: 12, 48>}, {pipeline_mode = #tpu.pipeline_mode<synchronous>, transform_indices = @transform_5, window_bounds = array<i64: 48, 12>}, {pipeline_mode = #tpu.pipeline_mode<synchronous>, transform_indices = @transform_6, window_bounds = array<i64: 32, 16>}, {pipeline_mode = #tpu.pipeline_mode<synchronous>, transform_indices = @transform_7, window_bounds = array<i64: 256, 1>}, {transform_indices = @transform_8, window_bounds = array<i64: 1, 32, 128>}]} {
    %c0 = arith.constant 0 : index
    %c0_0 = arith.constant 0 : index
    %0 = vector.load %arg10[%c0, %c0_0] : memref<256x1xf32, #tpu.memory_space<vmem>>, vector<256x1xf32>
    %c0_i32 = arith.constant 0 : i32
    %1 = arith.cmpi eq, %arg1, %c0_i32 : i32
    %c0_i32_1 = arith.constant 0 : i32
    %2 = arith.cmpi eq, %arg2, %c0_i32_1 : i32
    %3 = arith.andi %1, %2 : i1
    %4 = arith.extui %3 : i1 to i32
    %c0_i32_2 = arith.constant 0 : i32
    %5 = arith.cmpi ne, %4, %c0_i32_2 : i32
    scf.if %5 {
      %cst_22 = arith.constant 0xFF800000 : f32
      %53 = vector.broadcast %cst_22 : f32 to vector<48x1xf32>
      %c0_23 = arith.constant 0 : index
      %c0_24 = arith.constant 0 : index
      %54 = vector.load %arg12[%c0_23, %c0_24] : memref<48x1xf32, #tpu.memory_space<vmem>>, vector<48x1xf32>
      tpu.vector_store %arg12[%c0_23, %c0_24], %53 {strides = array<i32>} : memref<48x1xf32, #tpu.memory_space<vmem>>, vector<48x1xf32>,
    } else {
    }
    %c0_3 = arith.constant 0 : index
    %c0_4 = arith.constant 0 : index
    %c0_5 = arith.constant 0 : index
    %6 = vector.load %arg3[%c0_3, %c0_4, %c0_5] : memref<1x32x128xbf16, #tpu.memory_space<vmem>>, vector<1x32x128xbf16>
    %7 = vector.shape_cast %6 : vector<1x32x128xbf16> to vector<32x128xbf16>
    %c0_6 = arith.constant 0 : index
    %c0_7 = arith.constant 0 : index
    %c0_8 = arith.constant 0 : index
    %8 = vector.load %arg4[%c0_6, %c0_7, %c0_8] : memref<1x16x128xbf16, #tpu.memory_space<vmem>>, vector<1x16x128xbf16>
    %9 = vector.shape_cast %8 : vector<1x16x128xbf16> to vector<16x128xbf16>
    %10 = tpu.concatenate %7, %9 in 0 : vector<32x128xbf16>, vector<16x128xbf16> -> vector<48x128xbf16>
    %c0_9 = arith.constant 0 : index
    %c0_10 = arith.constant 0 : index
    %11 = vector.load %arg5[%c0_9, %c0_10] : memref<12x48xbf16, #tpu.memory_space<vmem>>, vector<12x48xbf16>
    %cst = arith.constant dense<0.000000e+00> : vector<12x128xf32>
    %12 = tpu.matmul %11, %10, %cst {dimension_numbers = #tpu.dot_dimension_numbers<[1], [0], [0], [1], [0, 0, 1, 1], [], []>} : vector<12x48xbf16>, vector<48x128xbf16>, vector<12x128xf32> -> vector<12x128xf32>
    %13 = vector.extract_strided_slice %0 {offsets = [0, 0], sizes = [12, 1], strides = [1, 1]} : vector<256x1xf32> to vector<12x1xf32>
    %14 = vector.broadcast %13 : vector<12x1xf32> to vector<12x128xf32>
    %15 = arith.addf %12, %14 : vector<12x128xf32>
    %cst_11 = arith.constant 0.000000e+00 : f32
    %16 = vector.broadcast %cst_11 : f32 to vector<12x128xf32>
    %17 = arith.maximumf %15, %16 : vector<12x128xf32>
    %c0_12 = arith.constant 0 : index
    %c0_13 = arith.constant 0 : index
    %18 = vector.load %arg6[%c0_12, %c0_13] : memref<48x12xbf16, #tpu.memory_space<vmem>>, vector<48x12xbf16>
    %19 = arith.truncf %17 : vector<12x128xf32> to vector<12x128xbf16>
    %cst_14 = arith.constant dense<0.000000e+00> : vector<48x128xf32>
    %20 = tpu.matmul %18, %19, %cst_14 {dimension_numbers = #tpu.dot_dimension_numbers<[1], [0], [0], [1], [0, 0, 1, 1], [], []>} : vector<48x12xbf16>, vector<12x128xbf16>, vector<48x128xf32> -> vector<48x128xf32>
    %21 = vector.extract_strided_slice %0 {offsets = [16, 0], sizes = [48, 1], strides = [1, 1]} : vector<256x1xf32> to vector<48x1xf32>
    %22 = vector.broadcast %21 : vector<48x1xf32> to vector<48x128xf32>
    %23 = arith.addf %20, %22 : vector<48x128xf32>
    %24 = vector.extract_strided_slice %23 {offsets = [0, 0], sizes = [32, 128], strides = [1, 1]} : vector<48x128xf32> to vector<32x128xf32>
    %cst_15 = arith.constant dense<0xFF800000> : vector<128xf32>
    %25 = vector.multi_reduction <maximumf>, %24, %cst_15 [0] : vector<32x128xf32> to vector<128xf32>
    %26 = vector.shape_cast %25 : vector<128xf32> to vector<1x128xf32>
    %27 = arith.negf %26 : vector<1x128xf32>
    %28 = math.exp %27 : vector<1x128xf32>
    %cst_16 = arith.constant 1.000000e+00 : f32
    %29 = vector.broadcast %cst_16 : f32 to vector<1x128xf32>
    %30 = arith.addf %29, %28 : vector<1x128xf32>
    %31 = arith.divf %29, %30 : vector<1x128xf32>
    %32 = vector.extract_strided_slice %23 {offsets = [32, 0], sizes = [16, 128], strides = [1, 1]} : vector<48x128xf32> to vector<16x128xf32>
    %cst_17 = arith.constant dense<0xFF800000> : vector<128xf32>
    %33 = vector.multi_reduction <maximumf>, %32, %cst_17 [0] : vector<16x128xf32> to vector<128xf32>
    %34 = vector.shape_cast %33 : vector<128xf32> to vector<1x128xf32>
    %35 = arith.negf %34 : vector<1x128xf32>
    %36 = math.exp %35 : vector<1x128xf32>
    %cst_18 = arith.constant 1.000000e+00 : f32
    %37 = vector.broadcast %cst_18 : f32 to vector<1x128xf32>
    %38 = arith.addf %37, %36 : vector<1x128xf32>
    %39 = arith.divf %37, %38 : vector<1x128xf32>
    %40 = arith.extf %7 : vector<32x128xbf16> to vector<32x128xf32>
    %41 = vector.broadcast %31 : vector<1x128xf32> to vector<32x128xf32>
    %42 = arith.mulf %41, %40 : vector<32x128xf32>
    %43 = arith.extf %9 : vector<16x128xbf16> to vector<16x128xf32>
    %44 = vector.broadcast %39 : vector<1x128xf32> to vector<16x128xf32>
    %45 = arith.mulf %44, %43 : vector<16x128xf32>
    %46 = tpu.concatenate %42, %45 in 0 : vector<32x128xf32>, vector<16x128xf32> -> vector<48x128xf32>
    %c0_i32_19 = arith.constant 0 : i32
    %47 = arith.cmpi eq, %arg1, %c0_i32_19 : i32
    %48 = arith.extui %47 : i1 to i32
    %c0_i32_20 = arith.constant 0 : i32
    %49 = arith.cmpi ne, %48, %c0_i32_20 : i32
    scf.if %49 {
      %53 = arith.truncf %46 : vector<48x128xf32> to vector<48x128xbf16>
      %c0_22 = arith.constant 0 : index
      %c0_23 = arith.constant 0 : index
      %54 = vector.load %arg7[%c0_22, %c0_23] : memref<12x48xbf16, #tpu.memory_space<vmem>>, vector<12x48xbf16>
      %cst_24 = arith.constant dense<0.000000e+00> : vector<12x128xf32>
      %55 = tpu.matmul %54, %53, %cst_24 {dimension_numbers = #tpu.dot_dimension_numbers<[1], [0], [0], [1], [0, 0, 1, 1], [], []>} : vector<12x48xbf16>, vector<48x128xbf16>, vector<12x128xf32> -> vector<12x128xf32>
      %56 = vector.extract_strided_slice %0 {offsets = [64, 0], sizes = [12, 1], strides = [1, 1]} : vector<256x1xf32> to vector<12x1xf32>
      %57 = vector.broadcast %56 : vector<12x1xf32> to vector<12x128xf32>
      %58 = arith.addf %55, %57 : vector<12x128xf32>
      %cst_25 = arith.constant 0.000000e+00 : f32
      %59 = vector.broadcast %cst_25 : f32 to vector<12x128xf32>
      %60 = arith.maximumf %58, %59 : vector<12x128xf32>
      %c0_26 = arith.constant 0 : index
      %c0_27 = arith.constant 0 : index
      %61 = vector.load %arg8[%c0_26, %c0_27] : memref<48x12xbf16, #tpu.memory_space<vmem>>, vector<48x12xbf16>
      %62 = arith.truncf %60 : vector<12x128xf32> to vector<12x128xbf16>
      %cst_28 = arith.constant dense<0.000000e+00> : vector<48x128xf32>
      %63 = tpu.matmul %61, %62, %cst_28 {dimension_numbers = #tpu.dot_dimension_numbers<[1], [0], [0], [1], [0, 0, 1, 1], [], []>} : vector<48x12xbf16>, vector<12x128xbf16>, vector<48x128xf32> -> vector<48x128xf32>
      %64 = vector.extract_strided_slice %0 {offsets = [80, 0], sizes = [48, 1], strides = [1, 1]} : vector<256x1xf32> to vector<48x1xf32>
      %65 = vector.broadcast %64 : vector<48x1xf32> to vector<48x128xf32>
      %66 = arith.addf %63, %65 : vector<48x128xf32>
      %c0_29 = arith.constant 0 : index
      %c0_30 = arith.constant 0 : index
      %67 = vector.load %arg12[%c0_29, %c0_30] : memref<48x1xf32, #tpu.memory_space<vmem>>, vector<48x1xf32>
      %cst_31 = arith.constant dense<0xFF800000> : vector<48xf32>
      %68 = vector.multi_reduction <maximumf>, %66, %cst_31 [1] : vector<48x128xf32> to vector<48xf32>
      %69 = vector.shape_cast %68 : vector<48xf32> to vector<48x1xf32>
      %70 = arith.maximumf %67, %69 : vector<48x1xf32>
      %c0_32 = arith.constant 0 : index
      %c0_33 = arith.constant 0 : index
      %71 = vector.load %arg12[%c0_32, %c0_33] : memref<48x1xf32, #tpu.memory_space<vmem>>, vector<48x1xf32>
      tpu.vector_store %arg12[%c0_32, %c0_33], %70 {strides = array<i32>} : memref<48x1xf32, #tpu.memory_space<vmem>>, vector<48x1xf32>,
    } else {
    }
    %c1_i32 = arith.constant 1 : i32
    %50 = arith.cmpi eq, %arg1, %c1_i32 : i32
    %51 = arith.extui %50 : i1 to i32
    %c0_i32_21 = arith.constant 0 : i32
    %52 = arith.cmpi ne, %51, %c0_i32_21 : i32
    scf.if %52 {
      %c0_22 = arith.constant 0 : index
      %c0_23 = arith.constant 0 : index
      %53 = vector.load %arg12[%c0_22, %c0_23] : memref<48x1xf32, #tpu.memory_space<vmem>>, vector<48x1xf32>
      %54 = arith.negf %53 : vector<48x1xf32>
      %55 = math.exp %54 : vector<48x1xf32>
      %cst_24 = arith.constant 1.000000e+00 : f32
      %56 = vector.broadcast %cst_24 : f32 to vector<48x1xf32>
      %57 = arith.addf %56, %55 : vector<48x1xf32>
      %58 = arith.divf %56, %57 : vector<48x1xf32>
      %59 = vector.extract_strided_slice %58 {offsets = [0, 0], sizes = [32, 1], strides = [1, 1]} : vector<48x1xf32> to vector<32x1xf32>
      %60 = vector.extract_strided_slice %46 {offsets = [0, 0], sizes = [32, 128], strides = [1, 1]} : vector<48x128xf32> to vector<32x128xf32>
      %61 = vector.broadcast %59 : vector<32x1xf32> to vector<32x128xf32>
      %62 = arith.mulf %61, %60 : vector<32x128xf32>
      %63 = vector.extract_strided_slice %58 {offsets = [32, 0], sizes = [16, 1], strides = [1, 1]} : vector<48x1xf32> to vector<16x1xf32>
      %64 = vector.extract_strided_slice %46 {offsets = [32, 0], sizes = [16, 128], strides = [1, 1]} : vector<48x128xf32> to vector<16x128xf32>
      %65 = vector.broadcast %63 : vector<16x1xf32> to vector<16x128xf32>
      %66 = arith.mulf %65, %64 : vector<16x128xf32>
      %c0_25 = arith.constant 0 : index
      %c0_26 = arith.constant 0 : index
      %67 = vector.load %arg9[%c0_25, %c0_26] : memref<32x16xbf16, #tpu.memory_space<vmem>>, vector<32x16xbf16>
      %68 = arith.truncf %66 : vector<16x128xf32> to vector<16x128xbf16>
      %cst_27 = arith.constant dense<0.000000e+00> : vector<32x128xf32>
      %69 = tpu.matmul %67, %68, %cst_27 {dimension_numbers = #tpu.dot_dimension_numbers<[1], [0], [0], [1], [0, 0, 1, 1], [], []>} : vector<32x16xbf16>, vector<16x128xbf16>, vector<32x128xf32> -> vector<32x128xf32>
      %70 = vector.extract_strided_slice %0 {offsets = [128, 0], sizes = [32, 1], strides = [1, 1]} : vector<256x1xf32> to vector<32x1xf32>
      %71 = vector.broadcast %70 : vector<32x1xf32> to vector<32x128xf32>
      %72 = arith.addf %69, %71 : vector<32x128xf32>
      %73 = vector.extract_strided_slice %0 {offsets = [160, 0], sizes = [32, 1], strides = [1, 1]} : vector<256x1xf32> to vector<32x1xf32>
      %74 = vector.broadcast %73 : vector<32x1xf32> to vector<32x128xf32>
      %75 = arith.mulf %72, %74 : vector<32x128xf32>
      %76 = vector.extract_strided_slice %0 {offsets = [192, 0], sizes = [32, 1], strides = [1, 1]} : vector<256x1xf32> to vector<32x1xf32>
      %77 = vector.broadcast %76 : vector<32x1xf32> to vector<32x128xf32>
      %78 = arith.addf %75, %77 : vector<32x128xf32>
      %cst_28 = arith.constant 0.000000e+00 : f32
      %79 = vector.broadcast %cst_28 : f32 to vector<32x128xf32>
      %80 = arith.maximumf %78, %79 : vector<32x128xf32>
      %81 = vector.extract_strided_slice %0 {offsets = [224, 0], sizes = [32, 1], strides = [1, 1]} : vector<256x1xf32> to vector<32x1xf32>
      %82 = arith.negf %81 : vector<32x1xf32>
      %83 = math.exp %82 : vector<32x1xf32>
      %cst_29 = arith.constant 1.000000e+00 : f32
      %84 = vector.broadcast %cst_29 : f32 to vector<32x1xf32>
      %85 = arith.addf %84, %83 : vector<32x1xf32>
      %86 = arith.divf %84, %85 : vector<32x1xf32>
      %87 = vector.broadcast %86 : vector<32x1xf32> to vector<32x128xf32>
      %88 = arith.mulf %87, %62 : vector<32x128xf32>
      %cst_30 = arith.constant 1.000000e+00 : f32
      %89 = vector.broadcast %cst_30 : f32 to vector<32x1xf32>
      %90 = arith.subf %89, %86 : vector<32x1xf32>
      %91 = vector.broadcast %90 : vector<32x1xf32> to vector<32x128xf32>
      %92 = arith.mulf %91, %80 : vector<32x128xf32>
      %93 = arith.addf %88, %92 : vector<32x128xf32>
      %c0_31 = arith.constant 0 : index
      %c0_32 = arith.constant 0 : index
      %c0_33 = arith.constant 0 : index
      %94 = vector.load %arg11[%c0_31, %c0_32, %c0_33] : memref<1x32x128xf32, #tpu.memory_space<vmem>>, vector<1x32x128xf32>
      %95 = vector.shape_cast %94 : vector<1x32x128xf32> to vector<32x128xf32>
      %96 = vector.shape_cast %93 : vector<32x128xf32> to vector<1x32x128xf32>
      tpu.vector_store %arg11[%c0_31, %c0_32, %c0_33], %96 {strides = array<i32>} : memref<1x32x128xf32, #tpu.memory_space<vmem>>, vector<1x32x128xf32>,
    } else {
    }
    return
  }
  func.func @transform_0(%arg0: i32, %arg1: i32, %arg2: i32) -> (i32, i32, i32) {
    %c0_i32 = arith.constant 0 : i32
    %c0_i32_0 = arith.constant 0 : i32
    return %arg0, %c0_i32, %arg2 : i32, i32, i32
  }
  func.func @transform_1(%arg0: i32, %arg1: i32, %arg2: i32) -> (i32, i32, i32) {
    %c0_i32 = arith.constant 0 : i32
    %c0_i32_0 = arith.constant 0 : i32
    return %arg0, %c0_i32, %arg2 : i32, i32, i32
  }
  func.func @transform_2(%arg0: i32, %arg1: i32, %arg2: i32) -> (i32, i32) {
    %c0_i32 = arith.constant 0 : i32
    %c0_i32_0 = arith.constant 0 : i32
    %c0_i32_1 = arith.constant 0 : i32
    return %c0_i32, %c0_i32_0 : i32, i32
  }
  func.func @transform_3(%arg0: i32, %arg1: i32, %arg2: i32) -> (i32, i32) {
    %c0_i32 = arith.constant 0 : i32
    %c0_i32_0 = arith.constant 0 : i32
    %c0_i32_1 = arith.constant 0 : i32
    return %c0_i32, %c0_i32_0 : i32, i32
  }
  func.func @transform_4(%arg0: i32, %arg1: i32, %arg2: i32) -> (i32, i32) {
    %c0_i32 = arith.constant 0 : i32
    %c0_i32_0 = arith.constant 0 : i32
    %c0_i32_1 = arith.constant 0 : i32
    return %c0_i32, %c0_i32_0 : i32, i32
  }
  func.func @transform_5(%arg0: i32, %arg1: i32, %arg2: i32) -> (i32, i32) {
    %c0_i32 = arith.constant 0 : i32
    %c0_i32_0 = arith.constant 0 : i32
    %c0_i32_1 = arith.constant 0 : i32
    return %c0_i32, %c0_i32_0 : i32, i32
  }
  func.func @transform_6(%arg0: i32, %arg1: i32, %arg2: i32) -> (i32, i32) {
    %c0_i32 = arith.constant 0 : i32
    %c0_i32_0 = arith.constant 0 : i32
    %c0_i32_1 = arith.constant 0 : i32
    return %c0_i32, %c0_i32_0 : i32, i32
  }
  func.func @transform_7(%arg0: i32, %arg1: i32, %arg2: i32) -> (i32, i32) {
    %c0_i32 = arith.constant 0 : i32
    %c0_i32_0 = arith.constant 0 : i32
    %c0_i32_1 = arith.constant 0 : i32
    return %c0_i32, %c0_i32_0 : i32, i32
  }
  func.func @transform_8(%arg0: i32, %arg1: i32, %arg2: i32) -> (i32, i32, i32) {
    %0 = arith.muli %arg2, %arg1 : i32
    %c0_i32 = arith.constant 0 : i32
    %c0_i32_0 = arith.constant 0 : i32
    return %arg0, %c0_i32, %0 : i32, i32, i32
  }
}

</mosaic_0001>

<bundles_post_ra>
// kernel: pointwise_gate6.1
= control target key start
LH: loop header
LB: loop body
LE: loop exit
PB: predicated region body
PF: predicated region fallthrough
CT: control target
= control target key end

     0   :  { %13 = vsyncpa [#allocation4], 0  ;;  %s2187_s0 = inlined_call_operand.vmem [shape: bf16[2,32,128], index: 0, kind: input, shape index: {}]   ;;  %s2188_s1 = inlined_call_operand.vmem [shape: bf16[2,16,128], index: 1, kind: input, shape index: {}]   ;;  %s2189_s2 = inlined_call_operand.vmem [shape: bf16[12,48], index: 2, kind: input, shape index: {}]   ;;  %s2190_s3 = inlined_call_operand.vmem [shape: bf16[48,12], index: 3, kind: input, shape index: {}]   ;;  %s2191_s4 = inlined_call_operand.vmem [shape: bf16[12,48], index: 4, kind: input, shape index: {}]   ;;  %s2192_s5 = inlined_call_operand.vmem [shape: bf16[48,12], index: 5, kind: input, shape index: {}]   ;;  %s2193_s6 = inlined_call_operand.vmem [shape: bf16[32,16], index: 6, kind: input, shape index: {}]   ;;  %s2194_s7 = inlined_call_operand.vmem [shape: f32[256,1], index: 7, kind: input, shape index: {}]   ;;  %s2195_s8 = inlined_call_operand.hbm [shape: f32[2,32,128], index: 8, kind: output, shape index: {}]  }
   0x1   :  { %15 = vsyncpa [#allocation4 + $0x1], 0  ;;  %s1746_s27 = smov 0   ;;  %s1748_s28 = smov 0  }
   0x2   :  { %s1750_s29 = smov 0   ;;  %s1752_s30 = smov 0  }
   0x3   :  { %s1754_s9 = smov 0   ;;  %s1756_s10 = smov 0  }
   0x4   :  { %s1758_s11 = smov 0   ;;  %s1760_s12 = smov 0  }
   0x5 LB: > { %2201 = sst [smem:[#allocation6_spill]] %s1668_s29  ;;  %s1315_s13 = sadd.s32 4294967295, %s1688_s12   ;;  %s1688_s12 = sphi %s1760_s12, %s21_s12   ;;  %s1684_s11 = sphi %s1758_s11, %s2215_s11   ;;  %s1680_s10 = sphi %s1756_s10, %s2214_s10   ;;  %s1676_s9 = sphi %s1754_s9, %s2213_s9   ;;  %s1672_s30 = sphi %s1752_s30, %s2212_s30   ;;  %s1668_s29 = sphi %s1750_s29, %s2211_s29   ;;  %s1664_s28 = sphi %s1748_s28, %s2217_s28   ;;  %s1660_s27 = sphi %s1746_s27, %s2216_s27  }
   0x6   : > { %2202 = sst [smem:[#allocation7_spill]] %s1680_s10  ;;  %s1316_s14 = sadd.s32 4294967294, %s1688_s12  }
   0x7   : > { %2203 = sst [smem:[#allocation8_spill]] %s1684_s11  ;;  %s36_s15 = sadd.s32 1, %s1680_s10 }
   0x8   : > { %p38_p0 = scmp.ge.s32.totalorder %s36_s15, 2  ;;  %s40_s16 = sadd.s32 1, %s1684_s11 }
   0x9   : > { %p243_p1 = scmp.ne.s32.totalorder %s1668_s29, %s1664_s28  ;;  %p244_p2 = scmp.eq.s32.totalorder %s1315_s13, 3 }
   0xa   : > { %s2219_s15 = smov (%p38_p0, %s36_s15), 0  ;;  %s2221_s16 = smov (!%p38_p0, %s40_s16), %s1684_s11 }
   0xb   : > { %2204 = sst [smem:[#allocation9_spill]] %s2219_s15  ;;  %p1795_p3 = por %p244_p2, %p243_p1 }
   0xc   : > { %p249_p4 = scmp.ne.s32.totalorder %s1664_s28, %s1660_s27  ;;  %p42_p5 = scmp.ge.s32.totalorder %s2221_s16, 2 }
   0xd   : > { %p250_p6 = scmp.eq.s32.totalorder %s1316_s14, 3  ;;  %p1319_p7 = scmp.ge.s32.totalorder %s1688_s12, 1 }
   0xe   : > { %p308_p8 = scmp.lt.s32.totalorder %s1688_s12, 5  ;;  %s2223_s16 = smov (%p42_p5, %s2221_s16), 0 }
   0xf   : > { %2206 = sst [smem:[#allocation10_spill]] %s2223_s16  ;;  %p1805_p9 = por %p250_p6, %p249_p4 }
  0x10   : > { %p309_p10 = pnand %p1319_p7, %p308_p8  ;;  %s228_s19 = ssub.s32 %s1684_s11, %s2223_s16 }
  0x11   : > { %s233_s20 = sadd.s32 1, %s1668_s29  ;;  %p231_p11 = scmp.eq.s32.totalorder %s228_s19, 0 }
  0x12   : > { %312 = sbr.rel (%p309_p10) target bundleno = 1507 (0x5e3), region = 52  ;;  %s2197_s22 = sand.u32 (!%p309_p10), 1, %s1664_s28  }
  0x13   : > { %s1813_s21 = scalar_select %p231_p11, %s1668_s29, %s233_s20  }
  0x14   : > { %p353_p12 = scmp.lt.s32.totalorder (!%p309_p10), %s1676_s9, 1  ;;  %s1830_s19 = sshll.u32 (!%p309_p10), %s2197_s22, 5 }
  0x15   : > { %2208 = sst [smem:[#allocation11_spill]] %s1813_s21  ;;  %p403_p13 = scmp.eq.s32.totalorder (!%p309_p10), %s1672_s30, 0 }
  0x16   : > { %s1988_s11 = scalar_lea.vmem (!%p309_p10), [#allocation3], %s1830_s19 }
  0x17   : > { %v371_v0 = vld [vmem:[%s2194_s7] sm:$0xff]  ;;  %v1823_v1 = vld [vmem:[%s2194_s7 + $0x8] sm:$0xff]  ;;  %v373_v2 = vld [vmem:[%s2194_s7 + $0x10] sm:$0xff]  ;;  %s354_s23 = scalar_select %p353_p12, %s1676_s9, 1  ;;  %vm409_vm0 = vcmask (%p403_p13), 7168   ;;  %v1690_v32 = vmov (%p403_p13), -inf  }
  0x18   : > { %v1835_v3 = vld [vmem:[%s2194_s7 + $0x18] sm:$0xff]  ;;  %v1840_v4 = vld [vmem:[%s2194_s7 + $0x20] sm:$0xff]  ;;  %v1845_v5 = vld [vmem:[%s2194_s7 + $0x28] sm:$0xff]  ;;  %410 = vst.msk [vmem:[#allocation2] sm:$0xff] (%p403_p13), %vm409_vm0, %v1690_v32 }
  0x19   : > { %v1851_v6 = vld [vmem:[%s2194_s7 + $0x30] sm:$0xff]  ;;  %v1856_v7 = vld [vmem:[%s2194_s7 + $0x38] sm:$0xff]  ;;  %v1861_v8 = vld [vmem:[%s2194_s7 + $0x40] sm:$0xff]  ;;  %s1368_s22 = sshll.u32 %s354_s23, 4  ;;  %s1369_s26 = sshll.u32 %s354_s23, 3  ;;  %411 = vst.msk [vmem:[#allocation2 + $0x8] sm:$0xff] (%p403_p13), %vm409_vm0, %v1690_v32 }
  0x1a   : > { %v1867_v9 = vld [vmem:[%s2194_s7 + $0x48] sm:$0xff]  ;;  %v1872_v10 = vld [vmem:[%s2194_s7 + $0x50] sm:$0xff]  ;;  %v1877_v11 = vld [vmem:[%s2194_s7 + $0x58] sm:$0xff]  ;;  %s1912_s10 = scalar_lea.vmem %s2187_s0, %s1368_s22  ;;  %s368_s13 = scalar_lea.vmem %s2188_s1, %s1369_s26  ;;  %412 = vst.msk [vmem:[#allocation2 + $0x10] sm:$0xff] (%p403_p13), %vm409_vm0, %v1690_v32 }
  0x1b   : > { %v1882_v12 = vld [vmem:[%s2194_s7 + $0x60] sm:$0xff]  ;;  %v1887_v13 = vld [vmem:[%s2194_s7 + $0x68] sm:$0xff]  ;;  %v1892_v14 = vld [vmem:[%s2194_s7 + $0x70] sm:$0xff]  ;;  %413 = vst.msk [vmem:[#allocation2 + $0x18] sm:$0xff] (%p403_p13), %vm409_vm0, %v1690_v32 }
  0x1c   : > { %v1897_v15 = vld [vmem:[%s2194_s7 + $0x78] sm:$0xff]  ;;  %v1902_v16 = vld [vmem:[%s2194_s7 + $0x80] sm:$0xff]  ;;  %v1907_v17 = vld [vmem:[%s2194_s7 + $0x88] sm:$0xff]  ;;  %414 = vst.msk [vmem:[#allocation2 + $0x20] sm:$0xff] (%p403_p13), %vm409_vm0, %v1690_v32 }
  0x1d   : > { %v1920_v18 = vld [vmem:[%s2194_s7 + $0x90] sm:$0xff]  ;;  %v1925_v19 = vld [vmem:[%s2194_s7 + $0x98] sm:$0xff]  ;;  %v1930_v20 = vld [vmem:[%s2194_s7 + $0xa0] sm:$0xff]  ;;  %408 = sbr.rel (!%p403_p13) target bundleno = 34 (0x22), region = 56  ;;  %415 = vst.msk [vmem:[#allocation2 + $0x28] sm:$0xff] (%p403_p13), %vm409_vm0, %v1690_v32 }
  0x1e   : > { %v1935_v21 = vld [vmem:[%s2194_s7 + $0xa8] sm:$0xff]  ;;  %v1940_v22 = vld [vmem:[%s2194_s7 + $0xb0] sm:$0xff]  ;;  %v1945_v23 = vld [vmem:[%s2194_s7 + $0xb8] sm:$0xff] }
  0x1f   : > { %v1950_v24 = vld [vmem:[%s2194_s7 + $0xc0] sm:$0xff]  ;;  %v1955_v25 = vld [vmem:[%s2194_s7 + $0xc8] sm:$0xff]  ;;  %v1960_v26 = vld [vmem:[%s2194_s7 + $0xd0] sm:$0xff] }
  0x20   : > { %v1965_v27 = vld [vmem:[%s2194_s7 + $0xd8] sm:$0xff]  ;;  %v1970_v28 = vld [vmem:[%s2194_s7 + $0xe0] sm:$0xff]  ;;  %v1975_v29 = vld [vmem:[%s2194_s7 + $0xe8] sm:$0xff] }
  0x21   : > { %v1980_v30 = vld [vmem:[%s2194_s7 + $0xf0] sm:$0xff]  ;;  %v1985_v31 = vld [vmem:[%s2194_s7 + $0xf8] sm:$0xff] }
  0x22 PF: > { %v1992_v33 = vld [vmem:[%s368_s13] sm:$0xff]   ;;  %v1995_v34 = vld [vmem:[%s1912_s10 + $0x8] sm:$0xff]   ;;  %v1691_v35 = vmov 0.0   ;;  %vm1692_vm1 = vmmov 0   ;;  %v1693_v37 = vmov 0   ;;  %vm457_vm2 = vcmask 392192  }
  0x23   : > { %1391 = vmatprep.subr.bf16.mxu0 %v1691_v35  ;;  %1397 = vmatprep.mubr.msk.bf16.mxu0 %vm1692_vm1, %v1691_v35  ;;  %v2001_v36 = vld [vmem:[%s1912_s10] sm:$0xff]   ;;  %vm566_vm3 = vcmask 1045504   ;;  %vm556_vm4 = vcmask 97280   ;;  %v1533_v52 = vld [vmem:[%s2190_s3 + $0x8] sm:$0xff]   ;;  %v1534_v53 = vld [vmem:[%s2190_s3 + $0x10] sm:$0xff]   ;;  %p1339_p0 = scmp.ne.s32.totalorder %s1672_s30, 0 }
  0x24   : > { %1401 = vmatprep.subr.bf16.mxu1 %v1691_v35  ;;  %1403 = vmatprep.mubr.msk.bf16.mxu1 %vm1692_vm1, %v1691_v35  ;;  %v1531_v38 = vld [vmem:[%s2189_s2] sm:$0x3f]  }
  0x25   : > { %1392 = vmatpush3.bf16.msra.mxu0 %v1992_v33  ;;  %1526 = vset.pattern.permute.xlu0 %v1693_v37  ;;  %v1532_v51 = vld [vmem:[%s2190_s3] sm:$0xff]  }
  0x26   : > { %1393 = vmatprep.subr.bf16.mxu0 %v1691_v35  ;;  %444 = vperm.xlu0 %1526, %v371_v0  }
  0x27   : > { %1527 = vset.pattern.permute.xlu1 %v1693_v37 }
  0x28   : > { %513 = vperm.xlu1 %1527, %v373_v2  }
  0x29   : > { %1394 = vmatpush3.bf16.msra.mxu0 %v1995_v34 }
  0x2a   : > { %1395 = vmatprep.subr.bf16.mxu0 %v1691_v35  ;;  %449 = vperm.xlu0 %1526, %v1823_v1  }
  0x2c   : > { %518 = vperm.xlu1 %1527, %v1835_v3  }
  0x2d   : > { %1396 = vmatpush3.bf16.msra.mxu0 %v2001_v36 }
  0x2e   : > { %523 = vperm.xlu0 %1526, %v1840_v4  }
  0x30   : > { %1398 = vmatmul.mubr.msk.bf16.vlgmr.msra.gmra.mxu0 %vm457_vm2, %v1531_v38  ;;  %528 = vperm.xlu1 %1527, %v1845_v5  }
  0x32   : > { %533 = vperm.xlu0 %1526, %v1851_v6  }
  0x34   : > { %538 = vperm.xlu1 %1527, %v1856_v7  }
  0xa1   : > { %v445_v39 = vpop.permute.xlu0 %444 }
  0xa3   : > { %v514_v54 = vpop.permute.xlu1 %513 }
  0xa5   : > { %v450_v43 = vpop.permute.xlu0 %449 }
  0xa7   : > { %v519_v58 = vpop.permute.xlu1 %518 }
  0xa9   : > { %v524_v62 = vpop.permute.xlu0 %523 }
  0xab   : > { %v529_v0 = vpop.permute.xlu1 %528 }
  0xad   : > { %v534_v38 = vpop.permute.xlu0 %533 }
  0xf0   : > { %v495_v40 = vpop.f32.mrf.mxu0 }
  0xf1   : > { %v496_v42 = vadd.f32 %v495_v40, %v445_v39  ;;  %v539_v40 = vpop.permute.xlu1 %538 }
  0xf2   : > { %v1399_v41 = vpop.f32.mrf.mxu0 }
  0xf3   : > { %v502_v47 = vmax.f32 %v496_v42, 0.0 }
  0xf4   : > { %v498_v44 = vpop.f32.mrf.mxu0 }
  0xf5   : > { %v499_v45 = vadd.f32 %v498_v44, %v450_v43 }
  0xf6   : > { %v1400_v46 = vpop.f32.mrf.mxu0 }
  0xf7   : > { %v503_v48 = vmax.f32 %v499_v45, 0.0 }
  0xf9   : > { %v510_v49 = vpack.c.bf16 %v503_v48, %v502_v47 }
  0xfb   : > { %v568_v50 = vsel %vm566_vm3, %v510_v49, 0 }
  0xfc   : > { %1402 = vmatpush3.bf16.msra.mxu1 %v568_v50 }
  0xff   : > { %1404 = vmatmul.mubr.msk.bf16.vlgmr.msra.gmra.mxu1 %vm556_vm4, %v1532_v51 }
 0x100   : > { %1407 = vmatprep.mubr.msk.bf16.mxu1 %vm1692_vm1, %v1691_v35 }
 0x107   : > { %1408 = vmatmul.mubr.msk.bf16.gmra.mxu1 %vm556_vm4, %v1533_v52 }
 0x108   : > { %1411 = vmatprep.mubr.msk.bf16.mxu1 %vm1692_vm1, %v1691_v35 }
 0x10f   : > { %1412 = vmatmul.mubr.msk.bf16.gmra.mxu1 %vm556_vm4, %v1534_v53 }
 0x1bf   : > { %v604_v55 = vpop.f32.mrf.mxu1 }
 0x1c0   : > { %v605_v2 = vadd.f32 %v604_v55, %v514_v54 }
 0x1c1   : > { %v1405_v56 = vpop.f32.mrf.mxu1 }
 0x1c3   : > { %v607_v57 = vpop.f32.mrf.mxu1 }
 0x1c4   : > { %v608_v63 = vadd.f32 %v607_v57, %v519_v58 }
 0x1c5   : > { %v1406_v59 = vpop.f32.mrf.mxu1 }
 0x1c6   : > { %v627_v6 = vmax.f32 %v605_v2, %v608_v63  ;;  %v657_v63 = vunpack.c.l.bf16 %v1995_v34  ;;  %v656_v2 = vunpack.c.h.bf16 %v2001_v36 }
 0x1c7   : > { %v612_v60 = vpop.f32.mrf.mxu1 }
 0x1c8   : > { %v613_v3 = vadd.f32 %v612_v60, %v524_v62 }
 0x1c9   : > { %v1409_v61 = vpop.f32.mrf.mxu1 }
 0x1cb   : > { %v615_v1 = vpop.f32.mrf.mxu1 }
 0x1cc   : > { %v616_v4 = vadd.f32 %v615_v1, %v529_v0  ;;  %v658_v0 = vunpack.c.h.bf16 %v1995_v34  ;;  %v655_v1 = vunpack.c.l.bf16 %v2001_v36 }
 0x1cd   : > { %v1410_v5 = vpop.f32.mrf.mxu1 }
 0x1ce   : > { %v628_v7 = vmax.f32 %v613_v3, %v616_v4 }
 0x1cf   : > { %v620_v32 = vpop.f32.mrf.mxu1 }
 0x1d0   : > { %v629_v35 = vmax.f32 %v627_v6, %v628_v7  ;;  %v621_v43 = vadd.f32 %v620_v32, %v534_v38  ;;  %v663_v32 = vunpack.c.l.bf16 %v1992_v33 }
 0x1d1   : > { %v1413_v37 = vpop.f32.mrf.mxu1 }
 0x1d2   : > { %v630_v39 = vrot.slane %v629_v35, 4 }
 0x1d3   : > { %v623_v41 = vpop.f32.mrf.mxu1 }
 0x1d4   : > { %v631_v42 = vmax.f32 %v629_v35, %v630_v39  ;;  %v624_v44 = vadd.f32 %v623_v41, %v539_v40  ;;  %v664_v35 = vunpack.c.h.bf16 %v1992_v33 }
 0x1d5   : > { %v1414_v45 = vpop.f32.mrf.mxu1 }
 0x1d6   : > { %v632_v46 = vrot.slane %v631_v42, 2  ;;  %v642_v47 = vmax.f32 %v621_v43, %v624_v44 }
 0x1d8   : > { %v633_v48 = vmax.f32 %v631_v42, %v632_v46  ;;  %v643_v49 = vrot.slane %v642_v47, 4 }
 0x1da   : > { %v634_v50 = vrot.slane %v633_v48, 1  ;;  %v644_v51 = vmax.f32 %v642_v47, %v643_v49 }
 0x1dc   : > { %v635_v52 = vmax.f32 %v633_v48, %v634_v50  ;;  %v645_v53 = vrot.slane %v644_v51, 2 }
 0x1de   : > { %v1337_v54 = vmul.f32 -1.442695, %v635_v52  ;;  %v646_v55 = vmax.f32 %v644_v51, %v645_v53 }
 0x1e0   : > { %1538 = vpow2.f32 %v1337_v54  ;;  %v647_v56 = vrot.slane %v646_v55, 1 }
 0x1e2   : > { %v648_v57 = vmax.f32 %v646_v55, %v647_v56 }
 0x1e4   : > { %v1338_v58 = vmul.f32 -1.442695, %v648_v57 }
 0x1e6   : > { %1540 = vpow2.f32 %v1338_v58 }
 0x1ed   : > { %v1539_v59 = vpop.eup %1538 }
 0x1ee   : > { %v639_v60 = vadd.f32 1.0, %v1539_v59 }
 0x1f0   : > { %1542 = vrcp.f32 %v639_v60 }
 0x1f3   : > { %v1541_v61 = vpop.eup %1540 }
 0x1f4   : > { %v652_v62 = vadd.f32 1.0, %v1541_v61 }
 0x1f6   : > { %1544 = vrcp.f32 %v652_v62 }
 0x1fd   : > { %v1543_v3 = vpop.eup %1542 }
 0x1fe   : > { %v2034_v4 = vmul.f32 %v1543_v3, %v655_v1  ;;  %v2036_v5 = vmul.f32 %v1543_v3, %v656_v2  ;;  %v2038_v6 = vmul.f32 %v1543_v3, %v657_v63  ;;  %v2040_v7 = vmul.f32 %v1543_v3, %v658_v0 }
 0x200   : > { %669 = sbr.rel (%p1339_p0) target bundleno = 1094 (0x446), region = 60 }
 0x203   : > { %v1545_v37 = vpop.eup %1544 }
 0x204   : > { %v2044_v38 = vmul.f32 %v1545_v37, %v663_v32  ;;  %v2046_v34 = vmul.f32 %v1545_v37, %v664_v35 }
 0x205   : > { %v1694_v39 = vmov 0.0   ;;  %v671_v40 = vpack.c.bf16 %v2040_v7, %v2038_v6  ;;  %vm1695_vm5 = vmmov 0   ;;  %v1696_v33 = vmov 0   ;;  %v1548_v42 = vld [vmem:[%s2191_s4] sm:$0x3f]  }
 0x206   : > { %v672_v36 = vpack.c.bf16 %v2046_v34, %v2044_v38  ;;  %1415 = vmatprep.subr.bf16.mxu0 %v1694_v39  ;;  %1425 = vmatprep.subr.bf16.mxu1 %v1694_v39  ;;  %v670_v41 = vpack.c.bf16 %v2036_v5, %v2034_v4  ;;  %vm881_vm6 = vcmask 7168  }
 0x207   : > { %1421 = vmatprep.mubr.msk.bf16.mxu0 %vm1695_vm5, %v1694_v39  ;;  %1546 = vset.pattern.permute.xlu0 %v1696_v33 }
 0x208   : > { %1416 = vmatpush3.bf16.msra.mxu0 %v672_v36  ;;  %677 = vperm.xlu0 %1546, %v1861_v8  }
 0x209   : > { %1417 = vmatprep.subr.bf16.mxu0 %v1694_v39  ;;  %1427 = vmatprep.mubr.msk.bf16.mxu1 %vm1695_vm5, %v1694_v39 }
 0x20a   : > { %1547 = vset.pattern.permute.xlu1 %v1696_v33  ;;  %v857_v33 = vld [vmem:[#allocation2] sm:$0xff] }
 0x20b   : > { %745 = vperm.xlu1 %1547, %v1872_v10  }
 0x20c   : > { %1418 = vmatpush3.bf16.msra.mxu0 %v671_v40  ;;  %682 = vperm.xlu0 %1546, %v1867_v9  }
 0x20d   : > { %1419 = vmatprep.subr.bf16.mxu0 %v1694_v39 }
 0x20f   : > { %750 = vperm.xlu1 %1547, %v1877_v11  }
 0x210   : > { %1420 = vmatpush3.bf16.msra.mxu0 %v670_v41  ;;  %755 = vperm.xlu0 %1546, %v1882_v12  }
 0x213   : > { %1422 = vmatmul.mubr.msk.bf16.vlgmr.msra.gmra.mxu0 %vm457_vm2, %v1548_v42  ;;  %760 = vperm.xlu1 %1547, %v1887_v13   ;;  %v1549_v13 = vld [vmem:[%s2192_s5] sm:$0xff]  }
 0x214   : > { %765 = vperm.xlu0 %1546, %v1892_v14   ;;  %v1550_v14 = vld [vmem:[%s2192_s5 + $0x8] sm:$0xff]  }
 0x217   : > { %770 = vperm.xlu1 %1547, %v1897_v15   ;;  %v1551_v15 = vld [vmem:[%s2192_s5 + $0x10] sm:$0xff]  }
 0x283   : > { %v678_v8 = vpop.permute.xlu0 %677 }
 0x286   : > { %v746_v50 = vpop.permute.xlu1 %745 }
 0x287   : > { %v683_v44 = vpop.permute.xlu0 %682 }
 0x28a   : > { %v751_v54 = vpop.permute.xlu1 %750 }
 0x28b   : > { %v756_v58 = vpop.permute.xlu0 %755 }
 0x28e   : > { %v761_v62 = vpop.permute.xlu1 %760 }
 0x28f   : > { %v766_v2 = vpop.permute.xlu0 %765 }
 0x292   : > { %v771_v37 = vpop.permute.xlu1 %770 }
 0x2d3   : > { %v727_v10 = vpop.f32.mrf.mxu0 }
 0x2d4   : > { %v728_v43 = vadd.f32 %v727_v10, %v678_v8  ;;  %v858_v8 = vld [vmem:[#allocation2 + $0x8] sm:$0xff] }
 0x2d5   : > { %v1423_v9 = vpop.f32.mrf.mxu0 }
 0x2d6   : > { %v734_v48 = vmax.f32 %v728_v43, 0.0  ;;  %v859_v43 = vld [vmem:[#allocation2 + $0x10] sm:$0xff] }
 0x2d7   : > { %v730_v45 = vpop.f32.mrf.mxu0 }
 0x2d8   : > { %v731_v46 = vadd.f32 %v730_v45, %v683_v44 }
 0x2d9   : > { %v1424_v47 = vpop.f32.mrf.mxu0 }
 0x2da   : > { %v735_v11 = vmax.f32 %v731_v46, 0.0  ;;  %v860_v46 = vld [vmem:[#allocation2 + $0x18] sm:$0xff] }
 0x2dc   : > { %v742_v49 = vpack.c.bf16 %v735_v11, %v734_v48  ;;  %v861_v11 = vld [vmem:[#allocation2 + $0x20] sm:$0xff] }
 0x2de   : > { %v798_v12 = vsel %vm566_vm3, %v742_v49, 0 }
 0x2df   : > { %1426 = vmatpush3.bf16.msra.mxu1 %v798_v12 }
 0x2e2   : > { %1428 = vmatmul.mubr.msk.bf16.vlgmr.msra.gmra.mxu1 %vm556_vm4, %v1549_v13  ;;  %v862_v13 = vld [vmem:[#allocation2 + $0x28] sm:$0xff] }
 0x2e3   : > { %1431 = vmatprep.mubr.msk.bf16.mxu1 %vm1695_vm5, %v1694_v39 }
 0x2ea   : > { %1432 = vmatmul.mubr.msk.bf16.gmra.mxu1 %vm556_vm4, %v1550_v14 }
 0x2eb   : > { %1435 = vmatprep.mubr.msk.bf16.mxu1 %vm1695_vm5, %v1694_v39 }
 0x2f2   : > { %1436 = vmatmul.mubr.msk.bf16.gmra.mxu1 %vm556_vm4, %v1551_v15 }
 0x3a2   : > { %v834_v51 = vpop.f32.mrf.mxu1 }
 0x3a3   : > { %v835_v52 = vadd.f32 %v834_v51, %v746_v50 }
 0x3a4   : > { %v1429_v53 = vpop.f32.mrf.mxu1 }
 0x3a5   : > { %863 = vmax.xlane.f32.xlu0 %v835_v52 }
 0x3a6   : > { %v837_v55 = vpop.f32.mrf.mxu1 }
 0x3a7   : > { %v838_v56 = vadd.f32 %v837_v55, %v751_v54 }
 0x3a8   : > { %v1430_v57 = vpop.f32.mrf.mxu1 }
 0x3a9   : > { %865 = vmax.xlane.f32.xlu1 %v838_v56 }
 0x3aa   : > { %v842_v59 = vpop.f32.mrf.mxu1 }
 0x3ab   : > { %v843_v60 = vadd.f32 %v842_v59, %v756_v58 }
 0x3ac   : > { %v1433_v61 = vpop.f32.mrf.mxu1 }
 0x3ad   : > { %867 = vmax.xlane.f32.xlu0 %v843_v60 }
 0x3ae   : > { %v845_v63 = vpop.f32.mrf.mxu1 }
 0x3af   : > { %v846_v0 = vadd.f32 %v845_v63, %v761_v62 }
 0x3b0   : > { %v1434_v1 = vpop.f32.mrf.mxu1 }
 0x3b1   : > { %869 = vmax.xlane.f32.xlu0 %v846_v0 }
 0x3b2   : > { %v850_v3 = vpop.f32.mrf.mxu1 }
 0x3b3   : > { %v851_v32 = vadd.f32 %v850_v3, %v766_v2 }
 0x3b4   : > { %v1437_v35 = vpop.f32.mrf.mxu1 }
 0x3b5   : > { %871 = vmax.xlane.f32.xlu1 %v851_v32 }
 0x3b6   : > { %v853_v36 = vpop.f32.mrf.mxu1 }
 0x3b7   : > { %v854_v39 = vadd.f32 %v853_v36, %v771_v37 }
 0x3b8   : > { %v1438_v40 = vpop.f32.mrf.mxu1 }
 0x3b9   : > { %873 = vmax.xlane.f32.xlu0 %v854_v39 }
 0x42e   : > { %v864_v41 = vpop.xlane.xlu0 %863 }
 0x42f   : > { %v875_v42 = vmax.f32 %v857_v33, %v864_v41 }
 0x431   : > { %882 = vst.msk [vmem:[#allocation2] sm:$0xff] %vm881_vm6, %v875_v42 }
 0x432   : > { %v866_v10 = vpop.xlane.xlu1 %865 }
 0x433   : > { %v876_v9 = vmax.f32 %v858_v8, %v866_v10 }
 0x435   : > { %883 = vst.msk [vmem:[#allocation2 + $0x8] sm:$0xff] %vm881_vm6, %v876_v9 }
 0x436   : > { %v868_v44 = vpop.xlane.xlu0 %867 }
 0x437   : > { %v877_v45 = vmax.f32 %v859_v43, %v868_v44 }
 0x439   : > { %884 = vst.msk [vmem:[#allocation2 + $0x10] sm:$0xff] %vm881_vm6, %v877_v45 }
 0x43a   : > { %v870_v47 = vpop.xlane.xlu0 %869 }
 0x43b   : > { %v878_v48 = vmax.f32 %v860_v46, %v870_v47 }
 0x43d   : > { %885 = vst.msk [vmem:[#allocation2 + $0x18] sm:$0xff] %vm881_vm6, %v878_v48 }
 0x43e   : > { %v872_v49 = vpop.xlane.xlu1 %871 }
 0x43f   : > { %v879_v12 = vmax.f32 %v861_v11, %v872_v49 }
 0x441   : > { %886 = vst.msk [vmem:[#allocation2 + $0x20] sm:$0xff] %vm881_vm6, %v879_v12 }
 0x442   : > { %v874_v14 = vpop.xlane.xlu0 %873 }
 0x443   : > { %v880_v15 = vmax.f32 %v862_v13, %v874_v14 }
 0x445   : > { %887 = vst.msk [vmem:[#allocation2 + $0x28] sm:$0xff] %vm881_vm6, %v880_v15 }
 0x446 PF: > { %p1348_p1 = scmp.ne.s32.totalorder %s1672_s30, 1 }
 0x448   : > { %891 = sbr.rel (%p1348_p1) target bundleno = 1482 (0x5ca), region = 64 }
 0x44d   : > { %v896_v50 = vld [vmem:[#allocation2 + $0x20] sm:$0xff]  ;;  %v897_v51 = vld [vmem:[#allocation2 + $0x28] sm:$0xff]  ;;  %v1697_v52 = vmov 0   ;;  %v894_v62 = vld [vmem:[#allocation2 + $0x10] sm:$0xff]  ;;  %v1359_v1 = vmul.f32 -1.442695, %v1970_v28 }
 0x44e   : > { %1552 = vset.pattern.permute.xlu0 %v1697_v52  ;;  %v1353_v53 = vmul.f32 -1.442695, %v896_v50  ;;  %v1354_v54 = vmul.f32 -1.442695, %v897_v51  ;;  %1553 = vset.pattern.permute.xlu1 %v1697_v52  ;;  %v892_v55 = vld [vmem:[#allocation2] sm:$0xff]  ;;  %vm1005_vm7 = vcmask 130048  }
 0x44f   : > { %982 = vperm.xlu1 %1553, %v1907_v17   ;;  %v1349_v56 = vmul.f32 -1.442695, %v892_v55  ;;  %v1351_v0 = vmul.f32 -1.442695, %v894_v62  ;;  %v1361_v3 = vmul.f32 -1.442695, %v1980_v30 }
 0x450   : > { %1556 = vpow2.f32 %v1353_v53  ;;  %v1362_v35 = vmul.f32 -1.442695, %v1985_v31  ;;  %v1554_v28 = vld [vmem:[%s2193_s6] sm:$0xff]   ;;  %v1555_v15 = vld [vmem:[%s2193_s6 + $0x8] sm:$0xff]  }
 0x451   : > { %1558 = vpow2.f32 %v1354_v54  ;;  %1441 = vmatprep.mubr.msk.bf16.mxu0 %vm1005_vm7, %v1554_v28 }
 0x452   : > { %1560 = vpow2.f32 %v1349_v56 }
 0x453   : > { %992 = vperm.xlu1 %1553, %v1925_v19   ;;  %v893_v19 = vld [vmem:[#allocation2 + $0x8] sm:$0xff] }
 0x454   : > { %v1350_v63 = vmul.f32 -1.442695, %v893_v19 }
 0x457   : > { %1068 = vperm.xlu1 %1553, %v1935_v21   ;;  %v895_v21 = vld [vmem:[#allocation2 + $0x18] sm:$0xff] }
 0x45b   : > { %1078 = vperm.xlu1 %1553, %v1945_v23   ;;  %v1352_v23 = vmul.f32 -1.442695, %v895_v21 }
 0x45d   : > { %v1557_v57 = vpop.eup %1556 }
 0x45e   : > { %v1559_v58 = vpop.eup %1558  ;;  %v920_v59 = vadd.f32 1.0, %v1557_v57 }
 0x45f   : > { %v921_v60 = vadd.f32 1.0, %v1559_v58  ;;  %1092 = vperm.xlu1 %1553, %v1955_v25   ;;  %v1561_v61 = vpop.eup %1560  ;;  %v1360_v25 = vmul.f32 -1.442695, %v1975_v29 }
 0x460   : > { %1562 = vrcp.f32 %v920_v59  ;;  %v916_v17 = vadd.f32 1.0, %v1561_v61 }
 0x461   : > { %1564 = vrcp.f32 %v921_v60 }
 0x462   : > { %1566 = vrcp.f32 %v916_v17 }
 0x463   : > { %1102 = vperm.xlu1 %1553, %v1965_v27   ;;  %1568 = vpow2.f32 %v1350_v63 }
 0x464   : > { %1570 = vpow2.f32 %v1351_v0 }
 0x465   : > { %1572 = vpow2.f32 %v1352_v23 }
 0x466   : > { %1574 = vpow2.f32 %v1359_v1 }
 0x467   : > { %1576 = vpow2.f32 %v1360_v25 }
 0x468   : > { %1578 = vpow2.f32 %v1361_v3 }
 0x469   : > { %1580 = vpow2.f32 %v1362_v35 }
 0x46d   : > { %v1563_v2 = vpop.eup %1562 }
 0x46e   : > { %960 = vperm.xlu0 %1552, %v1563_v2   ;;  %v1565_v27 = vpop.eup %1564 }
 0x46f   : > { %v1567_v32 = vpop.eup %1566 }
 0x470   : > { %936 = vperm.xlu1 %1553, %v1567_v32   ;;  %v1569_v37 = vpop.eup %1568 }
 0x471   : > { %v917_v29 = vadd.f32 1.0, %v1569_v37  ;;  %v1571_v30 = vpop.eup %1570 }
 0x472   : > { %965 = vperm.xlu0 %1552, %v1565_v27   ;;  %v1573_v36 = vpop.eup %1572  ;;  %v918_v31 = vadd.f32 1.0, %v1571_v30 }
 0x473   : > { %1582 = vrcp.f32 %v917_v29  ;;  %v919_v39 = vadd.f32 1.0, %v1573_v36  ;;  %v1575_v40 = vpop.eup %1574 }
 0x474   : > { %v1577_v33 = vpop.eup %1576  ;;  %v1125_v42 = vadd.f32 1.0, %v1575_v40 }
 0x475   : > { %1584 = vrcp.f32 %v919_v39  ;;  %v1126_v41 = vadd.f32 1.0, %v1577_v33  ;;  %v1579_v8 = vpop.eup %1578 }
 0x476   : > { %977 = vperm.xlu0 %1552, %v1902_v16   ;;  %1586 = vrcp.f32 %v918_v31  ;;  %v1581_v10 = vpop.eup %1580  ;;  %v1127_v16 = vadd.f32 1.0, %v1579_v8 }
 0x477   : > { %1588 = vrcp.f32 %v1126_v41  ;;  %v1128_v9 = vadd.f32 1.0, %v1581_v10 }
 0x478   : > { %1590 = vrcp.f32 %v1125_v42 }
 0x479   : > { %1592 = vrcp.f32 %v1128_v9 }
 0x47a   : > { %987 = vperm.xlu0 %1552, %v1920_v18   ;;  %1594 = vrcp.f32 %v1127_v16 }
 0x47e   : > { %1063 = vperm.xlu0 %1552, %v1930_v20  }
 0x480   : > { %v1583_v43 = vpop.eup %1582 }
 0x481   : > { %941 = vperm.xlu1 %1553, %v1583_v43  }
 0x482   : > { %1073 = vperm.xlu0 %1552, %v1940_v22   ;;  %v1585_v18 = vpop.eup %1584 }
 0x483   : > { %v1587_v20 = vpop.eup %1586 }
 0x484   : > { %v1589_v44 = vpop.eup %1588 }
 0x485   : > { %951 = vperm.xlu1 %1553, %v1585_v18   ;;  %v1591_v45 = vpop.eup %1590  ;;  %v1162_v47 = vsub.f32 1.0, %v1589_v44 }
 0x486   : > { %1087 = vperm.xlu0 %1552, %v1950_v24   ;;  %v1593_v46 = vpop.eup %1592  ;;  %v1161_v48 = vsub.f32 1.0, %v1591_v45 }
 0x487   : > { %v1595_v22 = vpop.eup %1594  ;;  %v1164_v11 = vsub.f32 1.0, %v1593_v46 }
 0x488   : > { %v1163_v24 = vsub.f32 1.0, %v1595_v22 }
 0x489   : > { %1144 = vperm.xlu1 %1553, %v1589_v44  }
 0x48a   : > { %1097 = vperm.xlu0 %1552, %v1960_v26  }
 0x48d   : > { %1154 = vperm.xlu1 %1553, %v1593_v46  }
 0x48e   : > { %946 = vperm.xlu0 %1552, %v1587_v20  }
 0x491   : > { %1172 = vperm.xlu1 %1553, %v1162_v47  }
 0x492   : > { %1139 = vperm.xlu0 %1552, %v1591_v45  }
 0x495   : > { %1182 = vperm.xlu1 %1553, %v1164_v11  }
 0x496   : > { %1149 = vperm.xlu0 %1552, %v1595_v22  }
 0x49a   : > { %1167 = vperm.xlu0 %1552, %v1161_v48  }
 0x49e   : > { %1177 = vperm.xlu0 %1552, %v1163_v24  }
 0x4ca   : > { %v983_v50 = vpop.permute.xlu1 %982 }
 0x4ce   : > { %v993_v52 = vpop.permute.xlu1 %992 }
 0x4d2   : > { %v1069_v54 = vpop.permute.xlu1 %1068 }
 0x4d6   : > { %v1079_v56 = vpop.permute.xlu1 %1078 }
 0x4e9   : > { %v961_v49 = vpop.permute.xlu0 %960 }
 0x4ea   : > { %v968_v12 = vmul.f32 %v961_v49, %v2044_v38  ;;  %v1093_v38 = vpop.permute.xlu1 %1092 }
 0x4ed   : > { %v966_v26 = vpop.permute.xlu0 %965 }
 0x4ee   : > { %v969_v13 = vmul.f32 %v966_v26, %v2046_v34  ;;  %v1103_v34 = vpop.permute.xlu1 %1102 }
 0x4f0   : > { %v974_v14 = vpack.c.bf16 %v969_v13, %v968_v12 }
 0x4f1   : > { %v978_v51 = vpop.permute.xlu0 %977 }
 0x4f2   : > { %1439 = vmatprep.subr.bf16.mxu0 %v974_v14  ;;  %v937_v60 = vpop.permute.xlu1 %936 }
 0x4f3   : > { %1440 = vmatpush3.bf16.msra.mxu0 %v974_v14  ;;  %v954_v30 = vmul.f32 %v937_v60, %v2034_v4 }
 0x4f5   : > { %v988_v53 = vpop.permute.xlu0 %987 }
 0x4f6   : > { %1442 = vmatmul.mubr.msk.bf16.vlgmr.msra.gmra.mxu0 %vm1005_vm7, %v1555_v15 }
 0x4f9   : > { %v1064_v55 = vpop.permute.xlu0 %1063 }
 0x4fc   : > { %v942_v61 = vpop.permute.xlu1 %941 }
 0x4fd   : > { %v1074_v57 = vpop.permute.xlu0 %1073  ;;  %v955_v4 = vmul.f32 %v942_v61, %v2036_v5 }
 0x500   : > { %v952_v62 = vpop.permute.xlu1 %951 }
 0x501   : > { %v1088_v58 = vpop.permute.xlu0 %1087  ;;  %v957_v10 = vmul.f32 %v952_v62, %v2040_v7 }
 0x504   : > { %v1145_v63 = vpop.permute.xlu1 %1144 }
 0x505   : > { %v1098_v59 = vpop.permute.xlu0 %1097  ;;  %v1158_v24 = vmul.f32 %v1145_v63, %v955_v4 }
 0x508   : > { %v1155_v21 = vpop.permute.xlu1 %1154 }
 0x509   : > { %v947_v17 = vpop.permute.xlu0 %946  ;;  %v1160_v47 = vmul.f32 %v1155_v21, %v957_v10 }
 0x50a   : > { %v956_v29 = vmul.f32 %v947_v17, %v2038_v6 }
 0x50c   : > { %v1173_v36 = vpop.permute.xlu1 %1172 }
 0x50d   : > { %v1140_v19 = vpop.permute.xlu0 %1139 }
 0x50e   : > { %v1157_v20 = vmul.f32 %v1140_v19, %v954_v30 }
 0x510   : > { %v1183_v22 = vpop.permute.xlu1 %1182 }
 0x511   : > { %v1150_v0 = vpop.permute.xlu0 %1149 }
 0x512   : > { %v1159_v42 = vmul.f32 %v1150_v0, %v956_v29 }
 0x515   : > { %v1168_v2 = vpop.permute.xlu0 %1167 }
 0x519   : > { %v1178_v8 = vpop.permute.xlu0 %1177 }
 0x5b6   : > { %v1443_v23 = vpop.f32.mrf.mxu0 }
 0x5b7   : > { %v1055_v1 = vadd.f32 %v1443_v23, %v988_v53 }
 0x5b8   : > { %v1046_v25 = vpop.f32.mrf.mxu0 }
 0x5b9   : > { %v1083_v3 = vmul.f32 %v1074_v57, %v1055_v1  ;;  %v1047_v27 = vadd.f32 %v1046_v25, %v978_v51 }
 0x5ba   : > { %v1444_v32 = vpop.f32.mrf.mxu0 }
 0x5bb   : > { %v1107_v35 = vadd.f32 %v1098_v59, %v1083_v3  ;;  %v1081_v28 = vmul.f32 %v1064_v55, %v1047_v27  ;;  %v1058_v37 = vadd.f32 %v1444_v32, %v993_v52 }
 0x5bc   : > { %v1049_v39 = vpop.f32.mrf.mxu0 }
 0x5bd   : > { %v1111_v31 = vmax.f32 %v1107_v35, 0.0  ;;  %v1105_v40 = vadd.f32 %v1088_v58, %v1081_v28  ;;  %v1084_v33 = vmul.f32 %v1079_v56, %v1058_v37  ;;  %v1050_v41 = vadd.f32 %v1049_v39, %v983_v50 }
 0x5bf   : > { %v1187_v9 = vmul.f32 %v1178_v8, %v1111_v31  ;;  %v1109_v16 = vmax.f32 %v1105_v40, 0.0  ;;  %v1108_v43 = vadd.f32 %v1103_v34, %v1084_v33  ;;  %v1082_v18 = vmul.f32 %v1069_v54, %v1050_v41 }
 0x5c1   : > { %v1191_v6 = vadd.f32 %v1187_v9, %v1159_v42  ;;  %v1185_v44 = vmul.f32 %v1168_v2, %v1109_v16  ;;  %v1112_v45 = vmax.f32 %v1108_v43, 0.0  ;;  %v1106_v46 = vadd.f32 %v1093_v38, %v1082_v18 }
 0x5c3   : > { %1195 = vst [vmem:[%s1988_s11 + $0x10] sm:$0xff] %v1191_v6  ;;  %v1189_v48 = vadd.f32 %v1185_v44, %v1157_v20  ;;  %v1188_v11 = vmul.f32 %v1183_v22, %v1112_v45  ;;  %v1110_v7 = vmax.f32 %v1106_v46, 0.0 }
 0x5c5   : > { %1193 = vst [vmem:[%s1988_s11] sm:$0xff] %v1189_v48  ;;  %v1192_v49 = vadd.f32 %v1188_v11, %v1160_v47  ;;  %v1186_v26 = vmul.f32 %v1173_v36, %v1110_v7 }
 0x5c7   : > { %1196 = vst [vmem:[%s1988_s11 + $0x18] sm:$0xff] %v1192_v49  ;;  %v1190_v12 = vadd.f32 %v1186_v26, %v1158_v24 }
 0x5c9   : > { %1194 = vst [vmem:[%s1988_s11 + $0x8] sm:$0xff] %v1190_v12 }
 0x5ca PF: > { %s1371_s24 = sshll.u32 %s1676_s9, 9  ;;  %s1213_s25 = sshll.u32 %s1988_s11, 4  ;;  %s2132_s25 = int_to_ptr.vmem [resolvable:$true] %s1213_s25 }
 0x5cb   : > { %s2129_s29 = scalar_lea.hbm %s2195_s8, %s1371_s24  ;;  %s2209_s23 = sand.u32 1, %s1664_s28  }
 0x5cc   : > { %s2136_s14 = scalar_lea.sflag [#allocation4], %s2209_s23  ;;  %s1596_s16 = scalar_lea.vmem %s2132_s25, 512 }
 0x5cd   : > { %p1597_p2 = scmp.ne.s32.totalorder %s2132_s25, %s1596_s16  ;;  %s1698_s9 = smov [#allocation3]  }
 0x5ce   : > { %s1600_s20 = sshll.u32 %s1698_s9, 4  ;;  %s1601_s20 = int_to_ptr.vmem [resolvable:$false] %s1600_s20 }
 0x5cf   : > { %p1598_p4 = pnand %p1597_p2, %p1795_p3  ;;  %s1602_s19 = scalar_lea.vmem %s1601_s20, 1024 }
 0x5d0   : > { %p1603_p6 = scmp.lt.s32.totalorder %s2132_s25, %s1601_s20  ;;  %p1604_p7 = scmp.lt.s32.totalorder %s1602_s19, %s1596_s16 }
 0x5d1   : > { %p1599_p5 = pneg %p1598_p4 }
 0x5d2   : > { %p1605_p8 = por %p1604_p7, %p1603_p6 }
 0x5d4   : > { %p1606_p10 = pnand %p1605_p8, %p1599_p5 }
 0x5d6   : > { %1609 = shalt.err (!%p1606_p10)
}
 0x5d7   : > { %s1610_s11 = scalar_lea.hbm %s2129_s29, 512  ;;  %s1614_s10 = scalar_lea.hbm %s2195_s8, 1024 }
 0x5d8   : > { %p1611_p11 = scmp.ne.s32.totalorder %s2129_s29, %s1610_s11  ;;  %p1615_p0 = scmp.lt.s32.totalorder %s2129_s29, %s2195_s8 }
 0x5d9   : > { %p1616_p1 = scmp.lt.s32.totalorder %s1614_s10, %s1610_s11 }
 0x5da   : > { %p1612_p12 = pnand %p1611_p11, %p1795_p3 }
 0x5db   : > { %p1617_p2 = por %p1616_p1, %p1615_p0 }
 0x5dc   : > { %p1613_p13 = pneg %p1612_p12 }
 0x5de   : > { %p1618_p4 = pnand %p1617_p2, %p1613_p13 }
 0x5e0   : > { %1621 = shalt.err (!%p1618_p4)
}
 0x5e1   : > { %s1699_s24 = smov 128   ;;  %s1700_s21 = smov 8  }
 0x5e2   : > { %1445 = dma.vmem_to_hbm [thread:$0]  (%p1795_p3), %s2132_s25, 512, %s2129_s29, %s2136_s14, %s1699_s24, %s1699_s24, %s1700_s21  }
 0x5e3 PF: > { %p1451_p5 = scmp.ge.s32.totalorder %s1688_s12, 2  ;;  %s1228_s26 = sand.u32 1, %s1660_s27  }
 0x5e4   : > { %s1229_s23 = scalar_lea.sflag [#allocation4], %s1228_s26 }
 0x5e5   : > { %p1448_p6 = pnand %p1451_p5, %p1805_p9 }
 0x5e7   : > { %p1449_p7 = pneg %p1448_p6 }
 0x5e9   : > { %1655 = dma.done.wait (%p1449_p7), %s1229_s23, 512  }
 0x5ea   : > { %1657 = vsyncadd (%p1449_p7), %s1229_s23, 4294966784  ;;  %s21_s12 = sadd.s32 1, %s1688_s12   ;;  %s2210_s16 = sld [smem:[#allocation6_spill]] }
 0x5eb   : > { %p18_p8 = scmp.ge.s32.totalorder %s21_s12, 6   ;;  %s2211_s29 = sld [smem:[#allocation11_spill]] }
 0x5ec   : > { %s2212_s30 = sld [smem:[#allocation7_spill]]  ;;  %s2216_s27 = smov %s1664_s28 }
 0x5ed   : > { %s2213_s9 = sld [smem:[#allocation8_spill]]  ;;  %20 = sbr.rel (!%p18_p8) target bundleno = 5 (0x5), region = 102 }
 0x5ee   : > { %s2214_s10 = sld [smem:[#allocation9_spill]] }
 0x5ef   : > { %s2215_s11 = sld [smem:[#allocation10_spill]] }
 0x5f0   : > { %s2217_s28 = smov %s2210_s16 }
 0x5f2   :  { %1234 = vsyncpa [#allocation4], 1 }
 0x5f3   :  { %1236 = vsyncpa [#allocation4 + $0x1], 1 }

</bundles_post_ra>
